<compile_context>
chip_gen: v7x
topology: tpu7x:2x2x1
jax: 0.10.0
libtpu: 0.0.40
codegen_flags: <defaults>
</compile_context>

<pallas_src>
import functools
import math

import jax
import jax.numpy as jnp
from jax.experimental import pallas as pl
from jax.experimental.pallas import tpu as pltpu

# ----------------------------- configuration --------------------------------
THETA_DIM = 4           # D
X_DIM = 6               # L
HIDDEN = 64             # hidden width of the default lampe MLP
TILE_B = 4096           # max batch tile (sublanes); sweep 2048/4096/8192
MIN_GRID_STEPS = 4      # >= 2 steps per TensorCore on v7x (2 TCs/chip)


def _round_up(n, m):
    return ((n + m - 1) // m) * m


def _compute_dtype():
    """bf16 elementwise/layer-2 path on v6e/v7x (bf16 VPUs); f32 elsewhere."""
    try:
        kind = jax.devices()[0].device_kind.lower()
    except Exception:
        return jnp.float32
    if any(tag in kind for tag in ("v6", "v7", "7x")):
        return jnp.bfloat16
    return jnp.float32


def _choose_tile(B, max_tile=TILE_B, min_steps=MIN_GRID_STEPS):
    """Largest tile <= max_tile that still yields >= min_steps grid steps
    (when the batch allows it), keeping tail padding small."""
    Bp128 = _round_up(max(B, 1), 128)
    tb = min(max_tile, max(128, _round_up(-(-Bp128 // min_steps), 128)))
    Bp = _round_up(B, tb)
    return tb, Bp


# ----------------------------- parameter setup ------------------------------
def init_amnre_params(key, D=THETA_DIM, L=X_DIM, H=HIDDEN):
    """PyTorch-layout parameters of the default lampe MLP classifier:
    Linear(2D+L, H) -> ReLU -> Linear(H, H) -> ReLU -> Linear(H, 1)."""
    Din = 2 * D + L
    k = jax.random.split(key, 6)

    def dense(kk, shape, fan_in):
        return jax.random.normal(kk, shape, jnp.float32) / math.sqrt(fan_in)

    W1 = dense(k[0], (H, Din), Din)
    b1 = dense(k[1], (H,), Din)
    W2 = dense(k[2], (H, H), H)
    b2 = dense(k[3], (H,), H)
    W3 = dense(k[4], (1, H), H)
    b3 = dense(k[5], (1,), H)
    return W1, b1, W2, b2, W3, b3


def prepare_params(torch_params, D=THETA_DIM, L=X_DIM):
    """Split W1 column-wise (theta | x | mask) and fold the layer-1 bias and
    the '2b-1' shift into precomputed weights, so the kernel never needs the
    concatenated feature tensor:
        concat(theta*b, x, 2b-1) @ W1.T + b1
          = (theta*b) @ w1t + x @ w1x + b @ (2*w1b) + (b1 - 1_D @ w1b)
    All weights stay f32; bf16 casts (v6e/v7x only) happen in-kernel."""
    W1, b1, W2, b2, W3, b3 = torch_params
    w1t = W1[:, :D].T                                # (D, H)
    w1x = W1[:, D:D + L].T                           # (L, H)
    w1b = W1[:, D + L:].T                            # (D, H), acts on (2b-1)
    w1b2 = 2.0 * w1b                                 # acts on b directly
    c1 = (b1 - jnp.sum(w1b, axis=0))[None, :]        # (1, H)
    return (w1t, w1x, w1b2, c1,
            W2.T,                                     # (H, H), (in, out)
            b2[None, :],                              # (1, H)
            W3.T,                                     # (H, 1)
            b3.reshape(1, 1))                         # (1, 1)


# ------------------------------- Pallas kernel -------------------------------
def amnre_kernel(theta_ref, x_ref, bf_ref,
                 w1t_ref, w1x_ref, w1b_ref, c1_ref,
                 w2_ref, b2_ref, w3_ref, b3_ref,
                 out_ref, *, compute_dtype):
    """Batch-major MLP: inputs (tb, D)/(tb, L)/(tb, D) f32, output (tb, 1) f32."""
    f32 = jnp.float32
    theta = theta_ref[...]                           # (tb, D) f32
    xb = x_ref[...]                                  # (tb, L) f32
    bf = bf_ref[...]                                 # (tb, D) f32 (mask 0/1)

    # Layer 1: three small f32 matmuls; bias and the "2b-1" shift are folded
    # into w1b_ref / c1_ref, so no concatenated feature tensor is built.
    a1 = (jnp.dot(theta * bf, w1t_ref[...], preferred_element_type=f32)
          + jnp.dot(xb, w1x_ref[...], preferred_element_type=f32)
          + jnp.dot(bf, w1b_ref[...], preferred_element_type=f32)
          + c1_ref[...])
    h1 = jnp.maximum(a1.astype(compute_dtype), 0)    # ReLU in compute dtype

    # Layer 2: (tb, H) @ (H, H); bf16 operands on v6e/v7x, f32 accumulation.
    a2 = jnp.dot(h1, w2_ref[...].astype(compute_dtype),
                 preferred_element_type=f32)
    h2 = jnp.maximum(a2.astype(compute_dtype)
                     + b2_ref[...].astype(compute_dtype), 0)

    # Head H -> 1: accumulation kept in f32.
    out_ref[...] = (jnp.dot(h2.astype(f32), w3_ref[...],
                            preferred_element_type=f32) + b3_ref[...])


# --------------------------------- wrapper -----------------------------------
def amnre_log_ratio(theta, x, b, params, *, max_tile=TILE_B,
                    min_steps=MIN_GRID_STEPS, compute_dtype=None):
    """theta: (*, D) or subset (*, K<=D); x: (*, L); b: (*, D) bool -> (*,)."""
    if compute_dtype is None:
        compute_dtype = _compute_dtype()

    theta = jnp.asarray(theta, jnp.float32)
    x = jnp.asarray(x, jnp.float32)
    b = jnp.asarray(b)
    D = b.shape[-1]
    L = x.shape[-1]

    if theta.shape[-1] < D:
        # Subset theta_b: scatter into zeros at the True positions of b.
        # TODO(synk): torch masked_scatter consumes the source flattened
        # globally; this row-wise version assumes each row of b has exactly
        # theta.shape[-1] True entries.
        lead = jnp.broadcast_shapes(theta.shape[:-1], b.shape[:-1])
        theta = jnp.broadcast_to(theta, lead + theta.shape[-1:])
        b = jnp.broadcast_to(b, lead + (D,))
        idx = jnp.clip(jnp.cumsum(b.astype(jnp.int32), axis=-1) - 1,
                       0, theta.shape[-1] - 1)
        theta = jnp.where(b, jnp.take_along_axis(theta, idx, axis=-1), 0.0)

    bf = b.astype(jnp.float32)
    batch = jnp.broadcast_shapes(theta.shape[:-1], x.shape[:-1], b.shape[:-1])
    theta2 = jnp.broadcast_to(theta, batch + (D,)).reshape(-1, D)
    x2 = jnp.broadcast_to(x, batch + (L,)).reshape(-1, L)
    bf2 = jnp.broadcast_to(bf, batch + (D,)).reshape(-1, D)

    B = theta2.shape[0]
    tb, Bp = _choose_tile(B, max_tile, min_steps)
    pad = Bp - B
    if pad:
        theta2 = jnp.pad(theta2, ((0, pad), (0, 0)))
        x2 = jnp.pad(x2, ((0, pad), (0, 0)))
        bf2 = jnp.pad(bf2, ((0, pad), (0, 0)))

    w1t, w1x, w1b2, c1, w2, b2, w3, b3 = params
    H = w2.shape[0]
    row = lambda i: (i, 0)          # batch-tiled operands
    const = lambda i: (0, 0)        # weights: same block every step (no re-DMA)

    out = pl.pallas_call(
        functools.partial(amnre_kernel, compute_dtype=compute_dtype),
        out_shape=jax.ShapeDtypeStruct((Bp, 1), jnp.float32),
        grid=(Bp // tb,),
        in_specs=[
            pl.BlockSpec((tb, D), row),      # theta
            pl.BlockSpec((tb, L), row),      # x
            pl.BlockSpec((tb, D), row),      # b (as f32)
            pl.BlockSpec((D, H), const),     # w1t
            pl.BlockSpec((L, H), const),     # w1x
            pl.BlockSpec((D, H), const),     # w1b2
            pl.BlockSpec((1, H), const),     # c1
            pl.BlockSpec((H, H), const),     # w2
            pl.BlockSpec((1, H), const),     # b2
            pl.BlockSpec((H, 1), const),     # w3
            pl.BlockSpec((1, 1), const),     # b3
        ],
        out_specs=pl.BlockSpec((tb, 1), row),
        compiler_params=pltpu.CompilerParams(
            dimension_semantics=("parallel",)),
    )(theta2, x2, bf2, w1t, w1x, w1b2, c1, w2, b2, w3, b3)

    return out[:B, 0].reshape(batch)


# ----------------------------------- main -------------------------------------
if __name__ == "__main__":
    key = jax.random.PRNGKey(0)
    k_theta, k_x, k_b, k_params = jax.random.split(key, 4)

    B = 16
    theta = jax.random.normal(k_theta, (B, THETA_DIM), jnp.float32)
    x = jax.random.normal(k_x, (B, X_DIM), jnp.float32)
    b = jax.random.bernoulli(k_b, 0.5, (B, THETA_DIM))

    torch_params = init_amnre_params(k_params)
    params = prepare_params(torch_params)
    cdt = _compute_dtype()

    logr = amnre_log_ratio(theta, x, b, params, compute_dtype=cdt)
    logr = jax.block_until_ready(logr)

    assert logr.shape == (B,), logr.shape
    assert bool(jnp.all(jnp.isfinite(logr))), "non-finite log-ratio"

    # Pure-JAX reference mirroring the kernel's dtype strategy.  Relative to a
    # pure-f32 PyTorch forward, the only deviation is the bf16 layer-2 path
    # selected on v6e/v7x (sub-1e-2 on these magnitudes).
    W1, b1_t, W2, b2_t, W3, b3_t = torch_params
    bfm = b.astype(jnp.float32)
    feats = jnp.concatenate([theta * bfm, x, 2.0 * bfm - 1.0], axis=-1)
    h1 = jnp.maximum((feats @ W1.T + b1_t).astype(cdt), 0)
    a2 = jnp.dot(h1, W2.T.astype(cdt), preferred_element_type=jnp.float32)
    h2 = jnp.maximum(a2.astype(cdt) + b2_t.astype(cdt), 0)
    ref = h2.astype(jnp.float32) @ W3[0] + b3_t[0]
    assert bool(jnp.allclose(logr, ref, atol=1e-2, rtol=1e-2)), (
        "kernel mismatch vs reference")

    print("KERNEL_OK")
</pallas_src>

<mosaic_0001>
module attributes {stable_mosaic.version = 11 : i64} {
  func.func @amnre_kernel(%arg0: i32, %arg1: memref<128x4xf32, #tpu.memory_space<vmem>>, %arg2: memref<128x6xf32, #tpu.memory_space<vmem>>, %arg3: memref<128x4xf32, #tpu.memory_space<vmem>>, %arg4: memref<4x64xf32, #tpu.memory_space<vmem>>, %arg5: memref<6x64xf32, #tpu.memory_space<vmem>>, %arg6: memref<4x64xf32, #tpu.memory_space<vmem>>, %arg7: memref<1x64xf32, #tpu.memory_space<vmem>>, %arg8: memref<64x64xf32, #tpu.memory_space<vmem>>, %arg9: memref<1x64xf32, #tpu.memory_space<vmem>>, %arg10: memref<64x1xf32, #tpu.memory_space<vmem>>, %arg11: memref<1x1xf32, #tpu.memory_space<vmem>>, %arg12: memref<128x1xf32, #tpu.memory_space<vmem>>) attributes {dimension_semantics = [#tpu.dimension_semantics<parallel>], iteration_bounds = array<i64: 1>, scalar_prefetch = 0 : i64, scratch_operands = 0 : i64, tpu.core_type = #tpu.core_type<tc>, window_params = [{transform_indices = @transform_0, window_bounds = array<i64: 128, 4>}, {transform_indices = @transform_1, window_bounds = array<i64: 128, 6>}, {transform_indices = @transform_2, window_bounds = array<i64: 128, 4>}, {pipeline_mode = #tpu.pipeline_mode<synchronous>, transform_indices = @transform_3, window_bounds = array<i64: 4, 64>}, {pipeline_mode = #tpu.pipeline_mode<synchronous>, transform_indices = @transform_4, window_bounds = array<i64: 6, 64>}, {pipeline_mode = #tpu.pipeline_mode<synchronous>, transform_indices = @transform_5, window_bounds = array<i64: 4, 64>}, {pipeline_mode = #tpu.pipeline_mode<synchronous>, transform_indices = @transform_6, window_bounds = array<i64: 1, 64>}, {pipeline_mode = #tpu.pipeline_mode<synchronous>, transform_indices = @transform_7, window_bounds = array<i64: 64, 64>}, {pipeline_mode = #tpu.pipeline_mode<synchronous>, transform_indices = @transform_8, window_bounds = array<i64: 1, 64>}, {pipeline_mode = #tpu.pipeline_mode<synchronous>, transform_indices = @transform_9, window_bounds = array<i64: 64, 1>}, {pipeline_mode = #tpu.pipeline_mode<synchronous>, transform_indices = @transform_10, window_bounds = array<i64: 1, 1>}, {transform_indices = @transform_11, window_bounds = array<i64: 128, 1>}]} {
    %c0 = arith.constant 0 : index
    %c0_0 = arith.constant 0 : index
    %0 = vector.load %arg1[%c0, %c0_0] : memref<128x4xf32, #tpu.memory_space<vmem>>, vector<128x4xf32>
    %c0_1 = arith.constant 0 : index
    %c0_2 = arith.constant 0 : index
    %1 = vector.load %arg2[%c0_1, %c0_2] : memref<128x6xf32, #tpu.memory_space<vmem>>, vector<128x6xf32>
    %c0_3 = arith.constant 0 : index
    %c0_4 = arith.constant 0 : index
    %2 = vector.load %arg3[%c0_3, %c0_4] : memref<128x4xf32, #tpu.memory_space<vmem>>, vector<128x4xf32>
    %3 = arith.mulf %0, %2 : vector<128x4xf32>
    %c0_5 = arith.constant 0 : index
    %c0_6 = arith.constant 0 : index
    %4 = vector.load %arg4[%c0_5, %c0_6] : memref<4x64xf32, #tpu.memory_space<vmem>>, vector<4x64xf32>
    %cst = arith.constant dense<0.000000e+00> : vector<128x64xf32>
    %5 = tpu.matmul %3, %4, %cst {dimension_numbers = #tpu.dot_dimension_numbers<[1], [0], [0], [1], [0, 0, 1, 1], [], []>} : vector<128x4xf32>, vector<4x64xf32>, vector<128x64xf32> -> vector<128x64xf32>
    %c0_7 = arith.constant 0 : index
    %c0_8 = arith.constant 0 : index
    %6 = vector.load %arg5[%c0_7, %c0_8] : memref<6x64xf32, #tpu.memory_space<vmem>>, vector<6x64xf32>
    %cst_9 = arith.constant dense<0.000000e+00> : vector<128x64xf32>
    %7 = tpu.matmul %1, %6, %cst_9 {dimension_numbers = #tpu.dot_dimension_numbers<[1], [0], [0], [1], [0, 0, 1, 1], [], []>} : vector<128x6xf32>, vector<6x64xf32>, vector<128x64xf32> -> vector<128x64xf32>
    %8 = arith.addf %5, %7 : vector<128x64xf32>
    %c0_10 = arith.constant 0 : index
    %c0_11 = arith.constant 0 : index
    %9 = vector.load %arg6[%c0_10, %c0_11] : memref<4x64xf32, #tpu.memory_space<vmem>>, vector<4x64xf32>
    %cst_12 = arith.constant dense<0.000000e+00> : vector<128x64xf32>
    %10 = tpu.matmul %2, %9, %cst_12 {dimension_numbers = #tpu.dot_dimension_numbers<[1], [0], [0], [1], [0, 0, 1, 1], [], []>} : vector<128x4xf32>, vector<4x64xf32>, vector<128x64xf32> -> vector<128x64xf32>
    %11 = arith.addf %8, %10 : vector<128x64xf32>
    %c0_13 = arith.constant 0 : index
    %c0_14 = arith.constant 0 : index
    %12 = vector.load %arg7[%c0_13, %c0_14] : memref<1x64xf32, #tpu.memory_space<vmem>>, vector<1x64xf32>
    %13 = vector.broadcast %12 : vector<1x64xf32> to vector<128x64xf32>
    %14 = arith.addf %11, %13 : vector<128x64xf32>
    %cst_15 = arith.constant 0.000000e+00 : f32
    %15 = vector.broadcast %cst_15 : f32 to vector<128x64xf32>
    %16 = arith.maximumf %14, %15 : vector<128x64xf32>
    %c0_16 = arith.constant 0 : index
    %c0_17 = arith.constant 0 : index
    %17 = vector.load %arg8[%c0_16, %c0_17] : memref<64x64xf32, #tpu.memory_space<vmem>>, vector<64x64xf32>
    %cst_18 = arith.constant dense<0.000000e+00> : vector<128x64xf32>
    %18 = tpu.matmul %16, %17, %cst_18 {dimension_numbers = #tpu.dot_dimension_numbers<[1], [0], [0], [1], [0, 0, 1, 1], [], []>} : vector<128x64xf32>, vector<64x64xf32>, vector<128x64xf32> -> vector<128x64xf32>
    %c0_19 = arith.constant 0 : index
    %c0_20 = arith.constant 0 : index
    %19 = vector.load %arg9[%c0_19, %c0_20] : memref<1x64xf32, #tpu.memory_space<vmem>>, vector<1x64xf32>
    %20 = vector.broadcast %19 : vector<1x64xf32> to vector<128x64xf32>
    %21 = arith.addf %18, %20 : vector<128x64xf32>
    %cst_21 = arith.constant 0.000000e+00 : f32
    %22 = vector.broadcast %cst_21 : f32 to vector<128x64xf32>
    %23 = arith.maximumf %21, %22 : vector<128x64xf32>
    %c0_22 = arith.constant 0 : index
    %c0_23 = arith.constant 0 : index
    %24 = vector.load %arg10[%c0_22, %c0_23] : memref<64x1xf32, #tpu.memory_space<vmem>>, vector<64x1xf32>
    %cst_24 = arith.constant dense<0.000000e+00> : vector<128x1xf32>
    %25 = tpu.matmul %23, %24, %cst_24 {dimension_numbers = #tpu.dot_dimension_numbers<[1], [0], [0], [1], [0, 0, 1, 1], [], []>} : vector<128x64xf32>, vector<64x1xf32>, vector<128x1xf32> -> vector<128x1xf32>
    %c0_25 = arith.constant 0 : index
    %c0_26 = arith.constant 0 : index
    %26 = vector.load %arg11[%c0_25, %c0_26] : memref<1x1xf32, #tpu.memory_space<vmem>>, vector<1x1xf32>
    %27 = vector.broadcast %26 : vector<1x1xf32> to vector<128x1xf32>
    %28 = arith.addf %25, %27 : vector<128x1xf32>
    %c0_27 = arith.constant 0 : index
    %c0_28 = arith.constant 0 : index
    %29 = vector.load %arg12[%c0_27, %c0_28] : memref<128x1xf32, #tpu.memory_space<vmem>>, vector<128x1xf32>
    tpu.vector_store %arg12[%c0_27, %c0_28], %28 {strides = array<i32>} : memref<128x1xf32, #tpu.memory_space<vmem>>, vector<128x1xf32>,
    return
  }
  func.func @transform_0(%arg0: i32) -> (i32, i32) {
    %c0_i32 = arith.constant 0 : i32
    %c0_i32_0 = arith.constant 0 : i32
    return %arg0, %c0_i32 : i32, i32
  }
  func.func @transform_1(%arg0: i32) -> (i32, i32) {
    %c0_i32 = arith.constant 0 : i32
    %c0_i32_0 = arith.constant 0 : i32
    return %arg0, %c0_i32 : i32, i32
  }
  func.func @transform_2(%arg0: i32) -> (i32, i32) {
    %c0_i32 = arith.constant 0 : i32
    %c0_i32_0 = arith.constant 0 : i32
    return %arg0, %c0_i32 : i32, i32
  }
  func.func @transform_3(%arg0: i32) -> (i32, i32) {
    %c0_i32 = arith.constant 0 : i32
    %c0_i32_0 = arith.constant 0 : i32
    %c0_i32_1 = arith.constant 0 : i32
    return %c0_i32, %c0_i32_0 : i32, i32
  }
  func.func @transform_4(%arg0: i32) -> (i32, i32) {
    %c0_i32 = arith.constant 0 : i32
    %c0_i32_0 = arith.constant 0 : i32
    %c0_i32_1 = arith.constant 0 : i32
    return %c0_i32, %c0_i32_0 : i32, i32
  }
  func.func @transform_5(%arg0: i32) -> (i32, i32) {
    %c0_i32 = arith.constant 0 : i32
    %c0_i32_0 = arith.constant 0 : i32
    %c0_i32_1 = arith.constant 0 : i32
    return %c0_i32, %c0_i32_0 : i32, i32
  }
  func.func @transform_6(%arg0: i32) -> (i32, i32) {
    %c0_i32 = arith.constant 0 : i32
    %c0_i32_0 = arith.constant 0 : i32
    %c0_i32_1 = arith.constant 0 : i32
    return %c0_i32, %c0_i32_0 : i32, i32
  }
  func.func @transform_7(%arg0: i32) -> (i32, i32) {
    %c0_i32 = arith.constant 0 : i32
    %c0_i32_0 = arith.constant 0 : i32
    %c0_i32_1 = arith.constant 0 : i32
    return %c0_i32, %c0_i32_0 : i32, i32
  }
  func.func @transform_8(%arg0: i32) -> (i32, i32) {
    %c0_i32 = arith.constant 0 : i32
    %c0_i32_0 = arith.constant 0 : i32
    %c0_i32_1 = arith.constant 0 : i32
    return %c0_i32, %c0_i32_0 : i32, i32
  }
  func.func @transform_9(%arg0: i32) -> (i32, i32) {
    %c0_i32 = arith.constant 0 : i32
    %c0_i32_0 = arith.constant 0 : i32
    %c0_i32_1 = arith.constant 0 : i32
    return %c0_i32, %c0_i32_0 : i32, i32
  }
  func.func @transform_10(%arg0: i32) -> (i32, i32) {
    %c0_i32 = arith.constant 0 : i32
    %c0_i32_0 = arith.constant 0 : i32
    %c0_i32_1 = arith.constant 0 : i32
    return %c0_i32, %c0_i32_0 : i32, i32
  }
  func.func @transform_11(%arg0: i32) -> (i32, i32) {
    %c0_i32 = arith.constant 0 : i32
    %c0_i32_0 = arith.constant 0 : i32
    return %arg0, %c0_i32 : i32, i32
  }
}

</mosaic_0001>

<bundles_post_ra>
// kernel: tpu_custom_call.1
= control target key start
LH: loop header
LB: loop body
LE: loop exit
PB: predicated region body
PF: predicated region fallthrough
CT: control target
= control target key end

     0   :  { %vm155_vm0 = vcmask 1045504   ;;  %vm106_vm1 = vcmask 48128   ;;  %vm353_vm2 = vcmask 1043456   ;;  %vm304_vm3 = vcmask 31744   ;;  %s2097_s4 = inlined_call_operand.vmem [shape: f32[6,64], index: 4, kind: input, shape index: {}]   ;;  %s2098_s1 = inlined_call_operand.vmem [shape: f32[128,6], index: 1, kind: input, shape index: {}]   ;;  %s2099_s3 = inlined_call_operand.vmem [shape: f32[4,64], index: 3, kind: input, shape index: {}]   ;;  %s2100_s5 = inlined_call_operand.vmem [shape: f32[4,64], index: 5, kind: input, shape index: {}]   ;;  %s2101_s0 = inlined_call_operand.vmem [shape: f32[128,4], index: 0, kind: input, shape index: {}]   ;;  %s2102_s2 = inlined_call_operand.vmem [shape: f32[128,4], index: 2, kind: input, shape index: {}]   ;;  %s2103_s7 = inlined_call_operand.vmem [shape: f32[64,64], index: 7, kind: input, shape index: {}]   ;;  %s2104_s9 = inlined_call_operand.vmem [shape: f32[64,1], index: 9, kind: input, shape index: {}]   ;;  %s2105_s6 = inlined_call_operand.vmem [shape: f32[1,64], index: 6, kind: input, shape index: {}]   ;;  %s2106_s10 = inlined_call_operand.<no memory space> [shape: f32[1,1], index: 10, kind: input, shape index: {}]   ;;  %s2107_s8 = inlined_call_operand.vmem [shape: f32[1,64], index: 8, kind: input, shape index: {}]   ;;  %s2108_s11 = inlined_call_operand.vmem [shape: f32[128,1], index: 11, kind: output, shape index: {}]  }
   0x1   :  { %v105_v0 = vld [vmem:[%s2097_s4] sm:$0x3f]  ;;  %v57_v2 = vld [vmem:[%s2098_s1 + $0x8] sm:$0xff]  ;;  %v58_v4 = vld [vmem:[%s2098_s1 + $0x10] sm:$0xff]  ;;  %vm769_vm4 = vcmask 523264   ;;  %vm1187_vm5 = vcmask 7168  }
   0x2   :  { %v56_v1 = vld [vmem:[%s2098_s1] sm:$0xff]  ;;  %1393 = vmatprep.subr.msk.mxu0 %vm155_vm0, %v105_v0  ;;  %1583 = vmatprep.subr.msk.mxu1 %vm155_vm0, %v105_v0  ;;  %v59_v5 = vld [vmem:[%s2098_s1 + $0x18] sm:$0xff]  ;;  %v61_v8 = vld [vmem:[%s2098_s1 + $0x28] sm:$0xff] }
   0x3   :  { %1395 = vmatprep.mubr.msk.f32.mxu0 %vm106_vm1, %v56_v1  ;;  %v104_v3 = vld [vmem:[%s2099_s3] sm:$0xf]  ;;  %1394 = vmatpush3.msk.msra.mxu0 %vm155_vm0, %v105_v0  ;;  %v62_v9 = vld [vmem:[%s2098_s1 + $0x30] sm:$0xff]  ;;  %v63_v12 = vld [vmem:[%s2098_s1 + $0x38] sm:$0xff] }
   0x4   :  { %1396 = vmatmul.mubr.msk.f32.vlgmr.msra.gmra.mrb[0].mxu0 %vm106_vm1, %v57_v2  ;;  %1419 = vmatprep.subr.msk.mxu0 %vm353_vm2, %v104_v3  ;;  %v502_v6 = vld [vmem:[%s2100_s5] sm:$0xf]  ;;  %v41_v14 = vld [vmem:[%s2101_s0 + $0x8] sm:$0xff]  ;;  %v42_v16 = vld [vmem:[%s2101_s0 + $0x10] sm:$0xff] }
   0x5   :  { %1420 = vmatpush3.msk.msra.mxu0 %vm353_vm2, %v104_v3  ;;  %1398 = vmatprep.mubr.msk.f32.mxu0 %vm106_vm1, %v58_v4  ;;  %v60_v7 = vld [vmem:[%s2098_s1 + $0x20] sm:$0xff]  ;;  %v1739_v15 = vld [vmem:[%s2102_s2 + $0x8] sm:$0xff]  ;;  %v1747_v17 = vld [vmem:[%s2102_s2 + $0x10] sm:$0xff] }
   0x6   :  { %1445 = vmatprep.subr.msk.mxu0 %vm353_vm2, %v502_v6  ;;  %1584 = vmatpush3.msk.msra.mxu1 %vm155_vm0, %v105_v0  ;;  %v40_v10 = vld [vmem:[%s2101_s0] sm:$0xff]  ;;  %v65_v19 = vld [vmem:[%s2098_s1 + $0x48] sm:$0xff]  ;;  %v89_v20 = vmul.f32 %v1739_v15, %v41_v14  ;;  %v43_v21 = vld [vmem:[%s2101_s0 + $0x18] sm:$0xff]  ;;  %v90_v23 = vmul.f32 %v1747_v17, %v42_v16 }
   0x7   :  { %v1725_v11 = vld [vmem:[%s2102_s2] sm:$0xff]  ;;  %v66_v22 = vld [vmem:[%s2098_s1 + $0x50] sm:$0xff]  ;;  %v1769_v24 = vld [vmem:[%s2102_s2 + $0x18] sm:$0xff] }
   0x8   :  { %1399 = vmatmul.mubr.msk.f32.gmra.mrb[2].mxu0 %vm106_vm1, %v59_v5  ;;  %v88_v13 = vmul.f32 %v1725_v11, %v40_v10  ;;  %v64_v18 = vld [vmem:[%s2098_s1 + $0x40] sm:$0xff]  ;;  %v755_v28 = vld [vmem:[%s2103_s7 + $0x8] sm:$0xff]  ;;  %v756_v29 = vld [vmem:[%s2103_s7 + $0x10] sm:$0xff]  ;;  %v91_v33 = vmul.f32 %v1769_v24, %v43_v21 }
   0x9   :  { %1401 = vmatprep.mubr.msk.f32.mxu0 %vm106_vm1, %v60_v7  ;;  %1407 = vmatprep.mubr.msk.f32.mxu1 %vm106_vm1, %v64_v18  ;;  %v44_v25 = vld [vmem:[%s2101_s0 + $0x20] sm:$0xff]  ;;  %v67_v30 = vld [vmem:[%s2098_s1 + $0x58] sm:$0xff]  ;;  %v45_v34 = vld [vmem:[%s2101_s0 + $0x28] sm:$0xff] }
   0xa   :  { %v1777_v26 = vld [vmem:[%s2102_s2 + $0x20] sm:$0xff]  ;;  %1408 = vmatmul.mubr.msk.f32.vlgmr.msra.gmra.mrb[0].mxu1 %vm106_vm1, %v65_v19  ;;  %v757_v32 = vld [vmem:[%s2103_s7 + $0x18] sm:$0xff]  ;;  %v1810_v38 = vld [vmem:[%s2102_s2 + $0x28] sm:$0xff] }
   0xb   :  { %1410 = vmatprep.mubr.msk.f32.mxu1 %vm106_vm1, %v66_v22  ;;  %v754_v27 = vld [vmem:[%s2103_s7] sm:$0xff]  ;;  %v1555_v36 = vpack.c.bf16 %v757_v32, %v756_v29  ;;  %v92_v37 = vmul.f32 %v1777_v26, %v44_v25  ;;  %v759_v40 = vld [vmem:[%s2103_s7 + $0x28] sm:$0xff]  ;;  %v46_v41 = vld [vmem:[%s2101_s0 + $0x30] sm:$0xff]  ;;  %v93_v44 = vmul.f32 %v1810_v38, %v45_v34 }
   0xc   :  { %1402 = vmatmul.mubr.msk.f32.gmra.mrb[4].mxu0 %vm106_vm1, %v61_v8  ;;  %v1551_v31 = vpack.c.bf16 %v755_v28, %v754_v27  ;;  %v68_v35 = vld [vmem:[%s2098_s1 + $0x60] sm:$0xff]  ;;  %v1824_v42 = vld [vmem:[%s2102_s2 + $0x30] sm:$0xff]  ;;  %v69_v43 = vld [vmem:[%s2098_s1 + $0x68] sm:$0xff] }
   0xd   :  { %1404 = vmatprep.mubr.msk.f32.mxu0 %vm106_vm1, %v62_v9  ;;  %v758_v39 = vld [vmem:[%s2103_s7 + $0x20] sm:$0xff]  ;;  %v70_v45 = vld [vmem:[%s2098_s1 + $0x70] sm:$0xff]  ;;  %v94_v47 = vmul.f32 %v1824_v42, %v46_v41  ;;  %v47_v48 = vld [vmem:[%s2101_s0 + $0x38] sm:$0xff] }
   0xe   :  { %1411 = vmatmul.mubr.msk.f32.gmra.mrb[2].mxu1 %vm106_vm1, %v67_v30  ;;  %1552 = vmatprep.subr.bf16.mxu1 %v1551_v31  ;;  %v1559_v46 = vpack.c.bf16 %v759_v40, %v758_v39  ;;  %v79_v49 = vld [vmem:[%s2102_s2 + $0x38] sm:$0xff]  ;;  %v48_v50 = vld [vmem:[%s2101_s0 + $0x40] sm:$0xff]  ;;  %v49_v55 = vld [vmem:[%s2101_s0 + $0x48] sm:$0xff] }
   0xf   :  { %1413 = vmatprep.mubr.msk.f32.mxu1 %vm106_vm1, %v68_v35  ;;  %1554 = vmatpush3.bf16.msra.mxu1 %v1551_v31  ;;  %v80_v51 = vld [vmem:[%s2102_s2 + $0x40] sm:$0xff]  ;;  %v71_v52 = vld [vmem:[%s2098_s1 + $0x78] sm:$0xff]  ;;  %v95_v53 = vmul.f32 %v79_v49, %v47_v48  ;;  %v81_v56 = vld [vmem:[%s2102_s2 + $0x48] sm:$0xff] }
  0x10   :  { %1405 = vmatmul.mubr.msk.f32.gmra.mrb[6].mxu0 %vm106_vm1, %v63_v12  ;;  %1556 = vmatprep.subr.bf16.mxu1 %v1555_v36  ;;  %v96_v54 = vmul.f32 %v80_v51, %v48_v50  ;;  %v50_v57 = vld [vmem:[%s2101_s0 + $0x50] sm:$0xff]  ;;  %v97_v59 = vmul.f32 %v81_v56, %v49_v55  ;;  %v51_v61 = vld [vmem:[%s2101_s0 + $0x58] sm:$0xff]  ;;  %v52_v63 = vld [vmem:[%s2101_s0 + $0x60] sm:$0xff] }
  0x11   :  { %1421 = vmatprep.mubr.msk.f32.mxu0 %vm304_vm3, %v88_v13  ;;  %v82_v58 = vld [vmem:[%s2102_s2 + $0x50] sm:$0xff]  ;;  %v83_v62 = vld [vmem:[%s2102_s2 + $0x58] sm:$0xff]  ;;  %v84_v0 = vld [vmem:[%s2102_s2 + $0x60] sm:$0xff] }
  0x12   :  { %1414 = vmatmul.mubr.msk.f32.gmra.mrb[4].mxu1 %vm106_vm1, %v69_v43  ;;  %v98_v60 = vmul.f32 %v82_v58, %v50_v57  ;;  %v99_v1 = vmul.f32 %v83_v62, %v51_v61  ;;  %v100_v2 = vmul.f32 %v84_v0, %v52_v63  ;;  %v53_v3 = vld [vmem:[%s2101_s0 + $0x68] sm:$0xff]  ;;  %v54_v5 = vld [vmem:[%s2101_s0 + $0x70] sm:$0xff]  ;;  %v55_v9 = vld [vmem:[%s2101_s0 + $0x78] sm:$0xff] }
  0x13   :  { %1416 = vmatprep.mubr.msk.f32.mxu1 %vm106_vm1, %v70_v45  ;;  %1558 = vmatpush3.bf16.msra.mxu1 %v1555_v36  ;;  %v85_v4 = vld [vmem:[%s2102_s2 + $0x68] sm:$0xff]  ;;  %v87_v10 = vld [vmem:[%s2102_s2 + $0x78] sm:$0xff]  ;;  %v981_v31 = vld [vmem:[%s2104_s9 + $0x10] sm:$0xff] }
  0x14   :  { %1422 = vmatmul.mubr.msk.f32.vlgmr.msra.gmra.mrb[0].mxu0 %vm304_vm3, %v89_v20  ;;  %1560 = vmatprep.subr.bf16.mxu1 %v1559_v46  ;;  %v101_v7 = vmul.f32 %v85_v4, %v53_v3  ;;  %v103_v12 = vmul.f32 %v87_v10, %v55_v9  ;;  %v761_v13 = vld [vmem:[%s2103_s7 + $0x38] sm:$0xff]  ;;  %v980_v16 = vld [vmem:[%s2104_s9 + $0x8] sm:$0xff]  ;;  %v983_v40 = vld [vmem:[%s2104_s9 + $0x20] sm:$0xff] }
  0x15   :  { %1446 = vmatpush3.msk.msra.mxu0 %vm353_vm2, %v502_v6  ;;  %1424 = vmatprep.mubr.msk.f32.mxu0 %vm304_vm3, %v90_v23  ;;  %v86_v6 = vld [vmem:[%s2102_s2 + $0x70] sm:$0xff]  ;;  %v982_v32 = vld [vmem:[%s2104_s9 + $0x18] sm:$0xff]  ;;  %v984_v41 = vld [vmem:[%s2104_s9 + $0x28] sm:$0xff] }
  0x16   :  { %1417 = vmatmul.mubr.msk.f32.gmra.mrb[6].mxu1 %vm106_vm1, %v71_v52  ;;  %v102_v8 = vmul.f32 %v86_v6, %v54_v5 }
  0x17   :  { %1562 = vmatpush3.bf16.msra.mxu1 %v1559_v46 }
  0x18   :  { %1425 = vmatmul.mubr.msk.f32.gmra.mrb[2].mxu0 %vm304_vm3, %v91_v33 }
  0x19   :  { %1427 = vmatprep.mubr.msk.f32.mxu0 %vm304_vm3, %v92_v37 }
  0x1c   :  { %1428 = vmatmul.mubr.msk.f32.gmra.mrb[4].mxu0 %vm304_vm3, %v93_v44 }
  0x1d   :  { %1430 = vmatprep.mubr.msk.f32.mxu0 %vm304_vm3, %v94_v47  ;;  %v1575_v47 = vpack.c.bf16 %v984_v41, %v983_v40 }
  0x20   :  { %1431 = vmatmul.mubr.msk.f32.gmra.mrb[6].mxu0 %vm304_vm3, %v95_v53 }
  0x21   :  { %1433 = vmatprep.mubr.msk.f32.mxu0 %vm304_vm3, %v96_v54 }
  0x24   :  { %1434 = vmatmul.mubr.msk.f32.gmra.mrb[8].mxu0 %vm304_vm3, %v97_v59 }
  0x25   :  { %1436 = vmatprep.mubr.msk.f32.mxu0 %vm304_vm3, %v98_v60 }
  0x28   :  { %1437 = vmatmul.mubr.msk.f32.gmra.mrb[10].mxu0 %vm304_vm3, %v99_v1 }
  0x29   :  { %1439 = vmatprep.mubr.msk.f32.mxu0 %vm304_vm3, %v100_v2 }
  0x2c   :  { %1440 = vmatmul.mubr.msk.f32.gmra.mrb[12].mxu0 %vm304_vm3, %v101_v7 }
  0x2d   :  { %1442 = vmatprep.mubr.msk.f32.mxu0 %vm304_vm3, %v102_v8 }
  0x30   :  { %1443 = vmatmul.mubr.msk.f32.gmra.mrb[14].mxu0 %vm304_vm3, %v103_v12 }
  0x31   :  { %1447 = vmatprep.mubr.msk.f32.mxu0 %vm304_vm3, %v1725_v11  ;;  %v760_v11 = vld [vmem:[%s2103_s7 + $0x30] sm:$0xff] }
  0x32   :  { %v1563_v14 = vpack.c.bf16 %v761_v13, %v760_v11 }
  0x34   :  { %1448 = vmatmul.mubr.msk.f32.vlgmr.msra.gmra.mrb[0].mxu0 %vm304_vm3, %v1739_v15  ;;  %1564 = vmatprep.subr.bf16.mxu1 %v1563_v14  ;;  %v979_v15 = vld [vmem:[%s2104_s9] sm:$0xff] }
  0x35   :  { %1450 = vmatprep.mubr.msk.f32.mxu0 %vm304_vm3, %v1747_v17  ;;  %1566 = vmatpush3.bf16.msra.mxu1 %v1563_v14  ;;  %v1567_v17 = vpack.c.bf16 %v980_v16, %v979_v15 }
  0x37   :  { %1568 = vmatprep.subr.bf16.mxu1 %v1567_v17 }
  0x38   :  { %1451 = vmatmul.mubr.msk.f32.gmra.mrb[2].mxu0 %vm304_vm3, %v1769_v24 }
  0x39   :  { %1453 = vmatprep.mubr.msk.f32.mxu0 %vm304_vm3, %v1777_v26  ;;  %v1955_v26 = vld [vmem:[%s2105_s6] ss:$0 sm:$0xff] }
  0x3c   :  { %1454 = vmatmul.mubr.msk.f32.gmra.mrb[4].mxu0 %vm304_vm3, %v1810_v38  ;;  %v1571_v38 = vpack.c.bf16 %v982_v32, %v981_v31 }
  0x3d   :  { %1456 = vmatprep.mubr.msk.f32.mxu0 %vm304_vm3, %v1824_v42 }
  0x40   :  { %1457 = vmatmul.mubr.msk.f32.gmra.mrb[6].mxu0 %vm304_vm3, %v79_v49 }
  0x41   :  { %1459 = vmatprep.mubr.msk.f32.mxu0 %vm304_vm3, %v80_v51 }
  0x44   :  { %1460 = vmatmul.mubr.msk.f32.gmra.mrb[8].mxu0 %vm304_vm3, %v81_v56 }
  0x45   :  { %1462 = vmatprep.mubr.msk.f32.mxu0 %vm304_vm3, %v82_v58 }
  0x48   :  { %1463 = vmatmul.mubr.msk.f32.gmra.mrb[10].mxu0 %vm304_vm3, %v83_v62 }
  0x49   :  { %1465 = vmatprep.mubr.msk.f32.mxu0 %vm304_vm3, %v84_v0 }
  0x4c   :  { %1466 = vmatmul.mubr.msk.f32.gmra.mrb[12].mxu0 %vm304_vm3, %v85_v4 }
  0x4d   :  { %1468 = vmatprep.mubr.msk.f32.mxu0 %vm304_vm3, %v86_v6 }
  0x50   :  { %1469 = vmatmul.mubr.msk.f32.gmra.mrb[14].mxu0 %vm304_vm3, %v87_v10 }
  0xdd   :  { %v1409_v18 = vpop.f32.mrb[0].mxu1 }
  0xde   :  { %v265_v19 = vpop.f32.mrb[1].mxu1 }
  0xe1   :  { %v1412_v20 = vpop.f32.mrb[2].mxu1 }
  0xe2   :  { %v275_v21 = vpop.f32.mrb[3].mxu1 }
  0xe5   :  { %v1944_v22 = vpop.f32.mrb[4].mxu1 }
  0xe6   :  { %v1946_v23 = vpop.f32.mrb[5].mxu1 }
  0xe9   :  { %v1948_v24 = vpop.f32.mrb[6].mxu1 }
  0xea   :  { %v1950_v25 = vpop.f32.mrb[7].mxu1 }
 0x107   :  { %v1449_v27 = vpop.f32.mrb[0].mxu0 }
 0x108   :  { %v723_v28 = vadd.f32 %v1449_v27, %v1955_v26  ;;  %v620_v29 = vpop.f32.mrb[1].mxu0 }
 0x109   :  { %v722_v30 = vadd.f32 %v1955_v26, %v620_v29  ;;  %v1260_v29 = vld [vmem:[%s2107_s8] ss:$0 sm:$0xff] }
 0x10a   :  { %v739_v35 = vmax.f32 %v723_v28, 0.0 }
 0x10b   :  { %v738_v33 = vmax.f32 %v722_v30, 0.0  ;;  %v1452_v34 = vpop.f32.mrb[2].mxu0 }
 0x10c   :  { %v725_v36 = vadd.f32 %v1452_v34, %v1955_v26  ;;  %v630_v37 = vpop.f32.mrb[3].mxu0 }
 0x10d   :  { %v724_v39 = vadd.f32 %v1955_v26, %v630_v37  ;;  %1487 = vmatprep.mubr.msk.f32.mxu1 %vm769_vm4, %v738_v33 }
 0x10e   :  { %1488 = vmatmul.mubr.msk.f32.vlgmr.msra.gmra.mrb[8].mxu1 %vm769_vm4, %v739_v35  ;;  %v741_v44 = vmax.f32 %v725_v36, 0.0 }
 0x10f   :  { %v740_v42 = vmax.f32 %v724_v39, 0.0  ;;  %v1455_v43 = vpop.f32.mrb[4].mxu0  ;;  %1570 = vmatpush3.bf16.msra.mxu1 %v1567_v17 }
 0x110   :  { %v727_v45 = vadd.f32 %v1455_v43, %v1955_v26  ;;  %v640_v46 = vpop.f32.mrb[5].mxu0  ;;  %1572 = vmatprep.subr.bf16.mxu1 %v1571_v38 }
 0x111   :  { %v726_v48 = vadd.f32 %v1955_v26, %v640_v46  ;;  %1490 = vmatprep.mubr.msk.f32.mxu1 %vm769_vm4, %v740_v42 }
 0x112   :  { %1491 = vmatmul.mubr.msk.f32.gmra.mrb[10].mxu1 %vm769_vm4, %v741_v44  ;;  %v743_v51 = vmax.f32 %v727_v45, 0.0 }
 0x113   :  { %v742_v49 = vmax.f32 %v726_v48, 0.0  ;;  %v1458_v50 = vpop.f32.mrb[6].mxu0  ;;  %1574 = vmatpush3.bf16.msra.mxu1 %v1571_v38 }
 0x114   :  { %v729_v52 = vadd.f32 %v1458_v50, %v1955_v26  ;;  %v650_v53 = vpop.f32.mrb[7].mxu0  ;;  %1576 = vmatprep.subr.bf16.mxu1 %v1575_v47 }
 0x115   :  { %v728_v54 = vadd.f32 %v1955_v26, %v650_v53  ;;  %1493 = vmatprep.mubr.msk.f32.mxu1 %vm769_vm4, %v742_v49 }
 0x116   :  { %1494 = vmatmul.mubr.msk.f32.gmra.mrb[12].mxu1 %vm769_vm4, %v743_v51  ;;  %v745_v57 = vmax.f32 %v729_v52, 0.0 }
 0x117   :  { %v744_v55 = vmax.f32 %v728_v54, 0.0  ;;  %v1461_v56 = vpop.f32.mrb[8].mxu0  ;;  %1578 = vmatpush3.bf16.msra.mxu1 %v1575_v47 }
 0x118   :  { %v1585_v58 = vadd.f32 %v1461_v56, %v1409_v18  ;;  %v660_v59 = vpop.f32.mrb[9].mxu0 }
 0x119   :  { %v1586_v60 = vadd.f32 %v660_v59, %v265_v19  ;;  %1496 = vmatprep.mubr.msk.f32.mxu1 %vm769_vm4, %v744_v55 }
 0x11a   :  { %v731_v61 = vadd.f32 %v1585_v58, %v1955_v26  ;;  %1497 = vmatmul.mubr.msk.f32.gmra.mrb[14].mxu1 %vm769_vm4, %v745_v57 }
 0x11b   :  { %v730_v62 = vadd.f32 %v1586_v60, %v1955_v26  ;;  %v1464_v63 = vpop.f32.mrb[10].mxu0 }
 0x11c   :  { %v1587_v0 = vadd.f32 %v1464_v63, %v1412_v20  ;;  %v670_v1 = vpop.f32.mrb[11].mxu0  ;;  %v747_v4 = vmax.f32 %v731_v61, 0.0 }
 0x11d   :  { %v746_v2 = vmax.f32 %v730_v62, 0.0  ;;  %v1588_v3 = vadd.f32 %v670_v1, %v275_v21 }
 0x11e   :  { %v733_v5 = vadd.f32 %v1587_v0, %v1955_v26 }
 0x11f   :  { %v732_v6 = vadd.f32 %v1588_v3, %v1955_v26  ;;  %v1467_v7 = vpop.f32.mrb[12].mxu0  ;;  %1499 = vmatprep.mubr.msk.f32.mxu1 %vm769_vm4, %v746_v2 }
 0x120   :  { %v1589_v8 = vadd.f32 %v1467_v7, %v1944_v22  ;;  %v680_v9 = vpop.f32.mrb[13].mxu0  ;;  %1500 = vmatmul.mubr.msk.f32.gmra.mrb[16].mxu1 %vm769_vm4, %v747_v4  ;;  %v749_v11 = vmax.f32 %v733_v5, 0.0 }
 0x121   :  { %v748_v10 = vmax.f32 %v732_v6, 0.0  ;;  %v1590_v12 = vadd.f32 %v680_v9, %v1946_v23 }
 0x122   :  { %v735_v13 = vadd.f32 %v1589_v8, %v1955_v26 }
 0x123   :  { %v734_v14 = vadd.f32 %v1590_v12, %v1955_v26  ;;  %v1470_v15 = vpop.f32.mrb[14].mxu0  ;;  %1502 = vmatprep.mubr.msk.f32.mxu1 %vm769_vm4, %v748_v10 }
 0x124   :  { %v1591_v16 = vadd.f32 %v1470_v15, %v1948_v24  ;;  %v690_v17 = vpop.f32.mrb[15].mxu0  ;;  %1503 = vmatmul.mubr.msk.f32.gmra.mrb[18].mxu1 %vm769_vm4, %v749_v11  ;;  %v751_v20 = vmax.f32 %v735_v13, 0.0  ;;  %v985_v24 = vld [vmem:[%s2104_s9 + $0x30] sm:$0xff] }
 0x125   :  { %v750_v18 = vmax.f32 %v734_v14, 0.0  ;;  %v1592_v19 = vadd.f32 %v690_v17, %v1950_v25  ;;  %v986_v25 = vld [vmem:[%s2104_s9 + $0x38] sm:$0xff] }
 0x126   :  { %v737_v21 = vadd.f32 %v1591_v16, %v1955_v26  ;;  %v1579_v28 = vpack.c.bf16 %v986_v25, %v985_v24 }
 0x127   :  { %v736_v22 = vadd.f32 %v1592_v19, %v1955_v26  ;;  %1505 = vmatprep.mubr.msk.f32.mxu1 %vm769_vm4, %v750_v18  ;;  %v16_v26 = vstv %s2106_s10 }
 0x128   :  { %1506 = vmatmul.mubr.msk.f32.gmra.mrb[20].mxu1 %vm769_vm4, %v751_v20  ;;  %v753_v27 = vmax.f32 %v737_v21, 0.0  ;;  %1580 = vmatprep.subr.bf16.mxu1 %v1579_v28  ;;  %17 = vst [vmem:[#allocation2] sm:$0x1] %v16_v26 }
 0x129   :  { %v752_v23 = vmax.f32 %v736_v22, 0.0  ;;  %1582 = vmatpush3.bf16.msra.mxu1 %v1579_v28 }
 0x12b   :  { %1508 = vmatprep.mubr.msk.f32.mxu1 %vm769_vm4, %v752_v23 }
 0x12c   :  { %1509 = vmatmul.mubr.msk.f32.gmra.mrb[22].mxu1 %vm769_vm4, %v753_v27 }
 0x12f   :  { %v1277_v14 = vld [vmem:[#allocation2] ss:$0 sm:$0xff] }
 0x1e1   :  { %v1489_v30 = vpop.f32.mrb[8].mxu1 }
 0x1e2   :  { %v890_v31 = vadd.f32 %v1489_v30, %v1260_v29  ;;  %v884_v32 = vpop.f32.mrb[9].mxu1 }
 0x1e3   :  { %v885_v33 = vadd.f32 %v1260_v29, %v884_v32 }
 0x1e4   :  { %v964_v36 = vmax.f32 %v890_v31, 0.0 }
 0x1e5   :  { %v963_v34 = vmax.f32 %v885_v33, 0.0  ;;  %v1492_v35 = vpop.f32.mrb[10].mxu1 }
 0x1e6   :  { %v900_v37 = vadd.f32 %v1492_v35, %v1260_v29  ;;  %v894_v38 = vpop.f32.mrb[11].mxu1 }
 0x1e7   :  { %v895_v39 = vadd.f32 %v1260_v29, %v894_v38  ;;  %1527 = vmatprep.mubr.msk.f32.mxu1 %vm769_vm4, %v963_v34 }
 0x1e8   :  { %1528 = vmatmul.mubr.msk.f32.vlgmr.msra.gmra.mrb[24].mxu1 %vm769_vm4, %v964_v36  ;;  %v966_v42 = vmax.f32 %v900_v37, 0.0 }
 0x1e9   :  { %v965_v40 = vmax.f32 %v895_v39, 0.0  ;;  %v1495_v41 = vpop.f32.mrb[12].mxu1 }
 0x1ea   :  { %v910_v43 = vadd.f32 %v1495_v41, %v1260_v29  ;;  %v904_v44 = vpop.f32.mrb[13].mxu1 }
 0x1eb   :  { %v905_v45 = vadd.f32 %v1260_v29, %v904_v44  ;;  %1530 = vmatprep.mubr.msk.f32.mxu1 %vm769_vm4, %v965_v40 }
 0x1ec   :  { %1531 = vmatmul.mubr.msk.f32.gmra.mrb[26].mxu1 %vm769_vm4, %v966_v42  ;;  %v968_v48 = vmax.f32 %v910_v43, 0.0 }
 0x1ed   :  { %v967_v46 = vmax.f32 %v905_v45, 0.0  ;;  %v1498_v47 = vpop.f32.mrb[14].mxu1 }
 0x1ee   :  { %v920_v49 = vadd.f32 %v1498_v47, %v1260_v29  ;;  %v914_v50 = vpop.f32.mrb[15].mxu1 }
 0x1ef   :  { %v915_v51 = vadd.f32 %v1260_v29, %v914_v50  ;;  %1533 = vmatprep.mubr.msk.f32.mxu1 %vm769_vm4, %v967_v46 }
 0x1f0   :  { %1534 = vmatmul.mubr.msk.f32.gmra.mrb[28].mxu1 %vm769_vm4, %v968_v48  ;;  %v970_v53 = vmax.f32 %v920_v49, 0.0 }
 0x1f1   :  { %v969_v52 = vmax.f32 %v915_v51, 0.0 }
 0x1f3   :  { %v1501_v54 = vpop.f32.mrb[16].mxu1  ;;  %1536 = vmatprep.mubr.msk.f32.mxu1 %vm769_vm4, %v969_v52 }
 0x1f4   :  { %v930_v55 = vadd.f32 %v1501_v54, %v1260_v29  ;;  %v924_v56 = vpop.f32.mrb[17].mxu1  ;;  %1537 = vmatmul.mubr.msk.f32.gmra.mrb[30].mxu1 %vm769_vm4, %v970_v53 }
 0x1f5   :  { %v925_v57 = vadd.f32 %v1260_v29, %v924_v56 }
 0x1f6   :  { %v972_v60 = vmax.f32 %v930_v55, 0.0 }
 0x1f7   :  { %v971_v58 = vmax.f32 %v925_v57, 0.0  ;;  %v1504_v59 = vpop.f32.mrb[18].mxu1 }
 0x1f8   :  { %v940_v61 = vadd.f32 %v1504_v59, %v1260_v29  ;;  %v934_v62 = vpop.f32.mrb[19].mxu1 }
 0x1f9   :  { %v935_v63 = vadd.f32 %v1260_v29, %v934_v62  ;;  %1539 = vmatprep.mubr.msk.f32.mxu1 %vm769_vm4, %v971_v58 }
 0x1fa   :  { %1540 = vmatmul.mubr.msk.f32.gmra.mrb[32].mxu1 %vm769_vm4, %v972_v60  ;;  %v974_v2 = vmax.f32 %v940_v61, 0.0 }
 0x1fb   :  { %v973_v0 = vmax.f32 %v935_v63, 0.0  ;;  %v1507_v1 = vpop.f32.mrb[20].mxu1 }
 0x1fc   :  { %v950_v3 = vadd.f32 %v1507_v1, %v1260_v29  ;;  %v944_v4 = vpop.f32.mrb[21].mxu1 }
 0x1fd   :  { %v945_v5 = vadd.f32 %v1260_v29, %v944_v4  ;;  %1542 = vmatprep.mubr.msk.f32.mxu1 %vm769_vm4, %v973_v0 }
 0x1fe   :  { %1543 = vmatmul.mubr.msk.f32.gmra.mrb[34].mxu1 %vm769_vm4, %v974_v2  ;;  %v976_v8 = vmax.f32 %v950_v3, 0.0 }
 0x1ff   :  { %v975_v6 = vmax.f32 %v945_v5, 0.0  ;;  %v1510_v7 = vpop.f32.mrb[22].mxu1 }
 0x200   :  { %v960_v9 = vadd.f32 %v1510_v7, %v1260_v29  ;;  %v954_v10 = vpop.f32.mrb[23].mxu1 }
 0x201   :  { %v955_v12 = vadd.f32 %v1260_v29, %v954_v10  ;;  %1545 = vmatprep.mubr.msk.f32.mxu1 %vm769_vm4, %v975_v6 }
 0x202   :  { %1546 = vmatmul.mubr.msk.f32.gmra.mrb[36].mxu1 %vm769_vm4, %v976_v8  ;;  %v978_v13 = vmax.f32 %v960_v9, 0.0 }
 0x203   :  { %v977_v11 = vmax.f32 %v955_v12, 0.0 }
 0x205   :  { %1548 = vmatprep.mubr.msk.f32.mxu1 %vm769_vm4, %v977_v11 }
 0x206   :  { %1549 = vmatmul.mubr.msk.f32.gmra.mrb[38].mxu1 %vm769_vm4, %v978_v13 }
 0x2bb   :  { %v1529_v15 = vpop.f32.mrb[24].mxu1 }
 0x2bc   :  { %v1114_v16 = vadd.f32 %v1529_v15, %v1277_v14  ;;  %v1108_v17 = vpop.f32.mrb[25].mxu1 }
 0x2bd   :  { %v1109_v18 = vadd.f32 %v1277_v14, %v1108_v17 }
 0x2be   :  { %1189 = vst.msk [vmem:[%s2108_s11 + $0x8] sm:$0xff] %vm1187_vm5, %v1114_v16 }
 0x2bf   :  { %1188 = vst.msk [vmem:[%s2108_s11] sm:$0xff] %vm1187_vm5, %v1109_v18  ;;  %v1532_v19 = vpop.f32.mrb[26].mxu1 }
 0x2c0   :  { %v1124_v20 = vadd.f32 %v1532_v19, %v1277_v14  ;;  %v1118_v21 = vpop.f32.mrb[27].mxu1 }
 0x2c1   :  { %v1119_v22 = vadd.f32 %v1277_v14, %v1118_v21 }
 0x2c2   :  { %1191 = vst.msk [vmem:[%s2108_s11 + $0x18] sm:$0xff] %vm1187_vm5, %v1124_v20 }
 0x2c3   :  { %1190 = vst.msk [vmem:[%s2108_s11 + $0x10] sm:$0xff] %vm1187_vm5, %v1119_v22  ;;  %v1535_v23 = vpop.f32.mrb[28].mxu1 }
 0x2c4   :  { %v1134_v27 = vadd.f32 %v1535_v23, %v1277_v14  ;;  %v1128_v24 = vpop.f32.mrb[29].mxu1 }
 0x2c5   :  { %v1129_v25 = vadd.f32 %v1277_v14, %v1128_v24 }
 0x2c6   :  { %1193 = vst.msk [vmem:[%s2108_s11 + $0x28] sm:$0xff] %vm1187_vm5, %v1134_v27 }
 0x2c7   :  { %1192 = vst.msk [vmem:[%s2108_s11 + $0x20] sm:$0xff] %vm1187_vm5, %v1129_v25  ;;  %v1538_v28 = vpop.f32.mrb[30].mxu1 }
 0x2c8   :  { %v1144_v26 = vadd.f32 %v1538_v28, %v1277_v14  ;;  %v1138_v29 = vpop.f32.mrb[31].mxu1 }
 0x2c9   :  { %v1139_v30 = vadd.f32 %v1277_v14, %v1138_v29 }
 0x2ca   :  { %1195 = vst.msk [vmem:[%s2108_s11 + $0x38] sm:$0xff] %vm1187_vm5, %v1144_v26 }
 0x2cb   :  { %1194 = vst.msk [vmem:[%s2108_s11 + $0x30] sm:$0xff] %vm1187_vm5, %v1139_v30 }
 0x2cd   :  { %v1541_v31 = vpop.f32.mrb[32].mxu1 }
 0x2ce   :  { %v1154_v32 = vadd.f32 %v1541_v31, %v1277_v14  ;;  %v1148_v33 = vpop.f32.mrb[33].mxu1 }
 0x2cf   :  { %v1149_v34 = vadd.f32 %v1277_v14, %v1148_v33 }
 0x2d0   :  { %1197 = vst.msk [vmem:[%s2108_s11 + $0x48] sm:$0xff] %vm1187_vm5, %v1154_v32 }
 0x2d1   :  { %1196 = vst.msk [vmem:[%s2108_s11 + $0x40] sm:$0xff] %vm1187_vm5, %v1149_v34  ;;  %v1544_v35 = vpop.f32.mrb[34].mxu1 }
 0x2d2   :  { %v1164_v36 = vadd.f32 %v1544_v35, %v1277_v14  ;;  %v1158_v37 = vpop.f32.mrb[35].mxu1 }
 0x2d3   :  { %v1159_v38 = vadd.f32 %v1277_v14, %v1158_v37 }
 0x2d4   :  { %1199 = vst.msk [vmem:[%s2108_s11 + $0x58] sm:$0xff] %vm1187_vm5, %v1164_v36 }
 0x2d5   :  { %1198 = vst.msk [vmem:[%s2108_s11 + $0x50] sm:$0xff] %vm1187_vm5, %v1159_v38  ;;  %v1547_v39 = vpop.f32.mrb[36].mxu1 }
 0x2d6   :  { %v1174_v40 = vadd.f32 %v1547_v39, %v1277_v14  ;;  %v1168_v41 = vpop.f32.mrb[37].mxu1 }
 0x2d7   :  { %v1169_v42 = vadd.f32 %v1277_v14, %v1168_v41 }
 0x2d8   :  { %1201 = vst.msk [vmem:[%s2108_s11 + $0x68] sm:$0xff] %vm1187_vm5, %v1174_v40 }
 0x2d9   :  { %1200 = vst.msk [vmem:[%s2108_s11 + $0x60] sm:$0xff] %vm1187_vm5, %v1169_v42  ;;  %v1550_v43 = vpop.f32.mrb[38].mxu1 }
 0x2da   :  { %v1184_v44 = vadd.f32 %v1550_v43, %v1277_v14  ;;  %v1178_v45 = vpop.f32.mrb[39].mxu1 }
 0x2db   :  { %v1179_v46 = vadd.f32 %v1277_v14, %v1178_v45 }
 0x2dc   :  { %1203 = vst.msk [vmem:[%s2108_s11 + $0x78] sm:$0xff] %vm1187_vm5, %v1184_v44 }
 0x2dd   :  { %1202 = vst.msk [vmem:[%s2108_s11 + $0x70] sm:$0xff] %vm1187_vm5, %v1179_v46 }

</bundles_post_ra>
